<compile_context>
chip_gen: v5e
topology: v5e:2x2
jax: 0.10.0
libtpu: 0.0.40
codegen_flags: <defaults>
</compile_context>

<pallas_src>
import functools
import math

import jax
import jax.numpy as jnp
from jax.experimental import pallas as pl
from jax.experimental.pallas import tpu as pltpu

D_MODEL = 32
MAX_LEN = 512
DROPOUT_P = 0.1


# ----------------------------------------------------------------------------
# Parameter / buffer setup (plain JAX glue, deterministic — module __init__)
# ----------------------------------------------------------------------------
def make_positional_encoding_table(d_model: int = D_MODEL,
                                   max_len: int = MAX_LEN) -> jnp.ndarray:
    """Builds the (max_len, 1, d_model) sinusoidal table, matching the PyTorch init."""
    position = jnp.arange(0, max_len, dtype=jnp.float32)[:, None]            # (L, 1)
    div_term = jnp.exp(
        jnp.arange(0, d_model, 2, dtype=jnp.float32)
        * (-math.log(10000.0) / d_model))                                     # (D/2,)
    pe = jnp.zeros((max_len, d_model), dtype=jnp.float32)
    pe = pe.at[:, 0::2].set(jnp.sin(position * div_term))
    pe = pe.at[:, 1::2].set(jnp.cos(position * div_term))
    # pe.unsqueeze(0).transpose(0, 1) -> (max_len, 1, d_model)
    return pe[:, None, :]


# ----------------------------------------------------------------------------
# Pallas kernels
#   x / out / keep blocks: (t_rows, B*D)   (lane-dense 2-D view)
#   pe block:              (t_rows, D)     (tiny; replicated across B in-kernel)
# ----------------------------------------------------------------------------
def _tiled_pe(x_ref, pe_ref):
    cols = x_ref.shape[1]
    d = pe_ref.shape[1]
    b = cols // d
    # Replicate the (t_rows, D) positional block across the batch so it lines
    # up with the (t_rows, B*D) x block.  Pure VPU/XLU work, hidden under DMA.
    return jnp.tile(pe_ref[...], (1, b))


def pe_add_kernel(x_ref, pe_ref, o_ref):
    o_ref[...] = x_ref[...] + _tiled_pe(x_ref, pe_ref)


def pe_add_dropout_kernel(x_ref, pe_ref, keep_ref, o_ref, *, scale):
    # Inverted dropout: keep_ref holds 0/1 (float), survivors scaled by 1/(1-p).
    y = x_ref[...] + _tiled_pe(x_ref, pe_ref)
    o_ref[...] = y * keep_ref[...] * jnp.asarray(scale, dtype=y.dtype)


# ----------------------------------------------------------------------------
# Wrapper
# ----------------------------------------------------------------------------
def _pick_tile_rows(n_rows: int, n_cols: int, itemsize: int,
                    target_bytes: int = 4 << 20) -> int:
    """Rows per block: ~target_bytes per block, multiple of 8, >=2 grid steps if possible."""
    rows = target_bytes // max(1, n_cols * itemsize)
    rows -= rows % 8
    rows = max(8, int(rows))
    if n_rows > 8:
        # Guarantee at least 2 grid steps so v7x can shard the "parallel" axis
        # across both TensorCores (no effect on single-TC v5e / v6e).
        half = -(-n_rows // 2)                 # cdiv(n_rows, 2)
        half = ((half + 7) // 8) * 8           # round up to a multiple of 8
        rows = min(rows, half)
    if rows >= n_rows:
        return n_rows                          # full extent — always legal
    return rows


def positional_encoding_forward(x: jnp.ndarray,
                                pe: jnp.ndarray,
                                *,
                                dropout_p: float = DROPOUT_P,
                                training: bool = False,
                                rng_key=None) -> jnp.ndarray:
    """x: (S, B, D) float32; pe: (max_len, 1, D) float32."""
    S, B, D = x.shape
    cols = B * D

    # Lane-dense 2-D view of x (bitcast-style reshape, no copy). The positional
    # table is passed as a tiny (S, D) array and replicated in-kernel — no
    # (S, B*D) pe slab is ever materialized in HBM.
    x2 = x.reshape(S, cols)
    pe2 = pe[:S, 0, :]                                        # (S, D), <= 64 KiB

    t_rows = _pick_tile_rows(S, cols, jnp.dtype(x.dtype).itemsize)
    grid = (pl.cdiv(S, t_rows),)

    cparams = pltpu.CompilerParams(
        dimension_semantics=("parallel",),        # shard steps over v7x's 2 TCs
        # ~4 MiB blocks, double-buffered x/out(/mask) => <= ~25 MiB live.
        vmem_limit_bytes=32 * 1024 * 1024,
    )

    x_spec = pl.BlockSpec((t_rows, cols), lambda i: (i, 0))
    pe_spec = pl.BlockSpec((t_rows, D), lambda i: (i, 0))
    out_spec = pl.BlockSpec((t_rows, cols), lambda i: (i, 0))

    if (not training) or dropout_p == 0.0:
        out2 = pl.pallas_call(
            pe_add_kernel,
            out_shape=jax.ShapeDtypeStruct((S, cols), x.dtype),
            grid=grid,
            in_specs=[x_spec, pe_spec],
            out_specs=out_spec,
            compiler_params=cparams,
        )(x2, pe2)
        return out2.reshape(S, B, D)

    # Training path: inverted dropout with a host-generated keep mask streamed
    # alongside x (portable; see TODO(synk) above for the on-chip PRNG variant).
    if rng_key is None:
        rng_key = jax.random.PRNGKey(0)
    scale = 1.0 / (1.0 - dropout_p)
    keep = jax.random.bernoulli(rng_key, 1.0 - dropout_p, (S, cols)).astype(x.dtype)

    kernel = functools.partial(pe_add_dropout_kernel, scale=scale)
    out2 = pl.pallas_call(
        kernel,
        out_shape=jax.ShapeDtypeStruct((S, cols), x.dtype),
        grid=grid,
        in_specs=[x_spec, pe_spec, pl.BlockSpec((t_rows, cols), lambda i: (i, 0))],
        out_specs=out_spec,
        compiler_params=cparams,
    )(x2, pe2, keep)
    return out2.reshape(S, B, D)


# ----------------------------------------------------------------------------
# Demo / correctness check
# ----------------------------------------------------------------------------
if __name__ == "__main__":
    key = jax.random.PRNGKey(0)
    S, B, D = 8, 2, D_MODEL                       # (seq_len, batch, d_model)
    x = jax.random.normal(key, (S, B, D), dtype=jnp.float32)

    pe = make_positional_encoding_table(D, MAX_LEN)
    ref = x + pe[:S]

    # Eval-mode forward (deterministic): dropout is identity, exactly like
    # nn.Dropout under model.eval().
    out = jax.block_until_ready(positional_encoding_forward(x, pe, training=False))
    assert out.shape == (S, B, D)
    assert out.dtype == jnp.float32
    assert jnp.allclose(out, ref, atol=1e-6, rtol=1e-6)

    # Training path: exact check against the same deterministic keep mask.
    drop_key = jax.random.PRNGKey(1234)
    out_tr = jax.block_until_ready(
        positional_encoding_forward(x, pe, training=True, rng_key=drop_key))
    scale = 1.0 / (1.0 - DROPOUT_P)
    keep = jax.random.bernoulli(drop_key, 1.0 - DROPOUT_P, (S, B * D))
    keep = keep.astype(jnp.float32).reshape(S, B, D)
    expected_tr = ref * keep * scale
    assert jnp.allclose(out_tr, expected_tr, atol=1e-5, rtol=1e-5)

    print("KERNEL_OK")
</pallas_src>

<mosaic_0001>
module attributes {stable_mosaic.version = 11 : i64} {
  func.func @pe_add_kernel(%arg0: i32, %arg1: memref<8x64xf32, #tpu.memory_space<vmem>>, %arg2: memref<8x32xf32, #tpu.memory_space<vmem>>, %arg3: memref<8x64xf32, #tpu.memory_space<vmem>>) attributes {dimension_semantics = [#tpu.dimension_semantics<parallel>], iteration_bounds = array<i64: 1>, scalar_prefetch = 0 : i64, scratch_operands = 0 : i64, tpu.core_type = #tpu.core_type<tc>, window_params = [{transform_indices = @transform_0, window_bounds = array<i64: 8, 64>}, {transform_indices = @transform_1, window_bounds = array<i64: 8, 32>}, {transform_indices = @transform_2, window_bounds = array<i64: 8, 64>}]} {
    %c0 = arith.constant 0 : index
    %c0_0 = arith.constant 0 : index
    %0 = vector.load %arg1[%c0, %c0_0] : memref<8x64xf32, #tpu.memory_space<vmem>>, vector<8x64xf32>
    %c0_1 = arith.constant 0 : index
    %c0_2 = arith.constant 0 : index
    %1 = vector.load %arg2[%c0_1, %c0_2] : memref<8x32xf32, #tpu.memory_space<vmem>>, vector<8x32xf32>
    %2 = tpu.concatenate %1, %1 in 1 : vector<8x32xf32>, vector<8x32xf32> -> vector<8x64xf32>
    %3 = arith.addf %0, %2 : vector<8x64xf32>
    %c0_3 = arith.constant 0 : index
    %c0_4 = arith.constant 0 : index
    %4 = vector.load %arg3[%c0_3, %c0_4] : memref<8x64xf32, #tpu.memory_space<vmem>>, vector<8x64xf32>
    tpu.vector_store %arg3[%c0_3, %c0_4], %3 {strides = array<i32>} : memref<8x64xf32, #tpu.memory_space<vmem>>, vector<8x64xf32>,
    return
  }
  func.func @transform_0(%arg0: i32) -> (i32, i32) {
    %c0_i32 = arith.constant 0 : i32
    %c0_i32_0 = arith.constant 0 : i32
    return %arg0, %c0_i32 : i32, i32
  }
  func.func @transform_1(%arg0: i32) -> (i32, i32) {
    %c0_i32 = arith.constant 0 : i32
    %c0_i32_0 = arith.constant 0 : i32
    return %arg0, %c0_i32 : i32, i32
  }
  func.func @transform_2(%arg0: i32) -> (i32, i32) {
    %c0_i32 = arith.constant 0 : i32
    %c0_i32_0 = arith.constant 0 : i32
    return %arg0, %c0_i32 : i32, i32
  }
}

</mosaic_0001>

<bundles_post_ra>
// kernel: tpu_custom_call.1
= control target key start
LH: loop header
LB: loop body
LE: loop exit
PB: predicated region body
PF: predicated region fallthrough
CT: control target
= control target key end

     0   :  { %7 = vsyncpa [#allocation3], 0  ;;  %s179_s0 = inlined_call_operand.hbm [shape: f32[8,64], index: 0, kind: input, shape index: {}]   ;;  %s180_s1 = inlined_call_operand.hbm [shape: f32[8,32], index: 1, kind: input, shape index: {}]   ;;  %s181_s2 = inlined_call_operand.hbm [shape: f32[8,64], index: 2, kind: output, shape index: {}]  }
   0x1   :  { %8 = vsyncpa [#allocation6], 0 }
   0x2   :  { %9 = vsyncpa [#allocation4], 0  ;;  %s15_s11 = sshll.u32 %s179_s0, 4  ;;  %s151_s12 = smov [#allocation2]   ;;  %s16_s11 = int_to_ptr.hbm [resolvable:$true] %s15_s11 }
   0x3   :  { %s17_s13 = sshll.u32 %s151_s12, 4  ;;  %s26_s16 = sshll.u32 %s180_s1, 4  ;;  %s18_s13 = int_to_ptr.vmem [resolvable:$true] %s17_s13  ;;  %s27_s16 = int_to_ptr.hbm [resolvable:$true] %s26_s16 }
   0x4   :  { %20 = dma.hbm_to_vmem [thread:$0]  %s16_s11, 128, %s18_s13, [#allocation3]  }
   0x5   :  { %s152_s17 = smov [#allocation5]  }
   0x6   :  { %s28_s18 = sshll.u32 %s152_s17, 4  ;;  %s29_s18 = int_to_ptr.vmem [resolvable:$true] %s28_s18 }
   0x7   :  { %31 = dma.hbm_to_vmem [thread:$0]  %s27_s16, 128, %s29_s18, [#allocation6]  }
   0x8   :  { %145 = dma.done.wait [#allocation3], 128  }
   0x9   :  { %146 = vsyncadd [#allocation3], 4294967168 }
   0xa   :  { %147 = dma.done.wait [#allocation6], 128  }
   0xb   :  { %148 = vsyncadd [#allocation6], 4294967168  ;;  %v41_v0 = vld [vmem:[#allocation5] sm:$0xff]  ;;  %s153_s0 = smov 32   ;;  %vm46_vm0 = vcmask 261120   ;;  %v40_v1 = vld [vmem:[#allocation2] sm:$0xff] }
   0xc   :  { %43 = vrot.lane.b32.xlu0 %v41_v0, %s153_s0  ;;  %s154_s19 = smov [#allocation7]   ;;  %s58_s1 = sshll.u32 %s181_s2, 4  ;;  %vm49_vm1 = vcmask 523264   ;;  %s59_s1 = int_to_ptr.hbm [resolvable:$true] %s58_s1 }
   0xd   :  { %s56_s20 = sshll.u32 %s154_s19, 4  ;;  %s57_s20 = int_to_ptr.vmem [resolvable:$true] %s56_s20 }
  0x7e   :  { %v44_v2 = vpop.permute.xlu0 %43 }
  0x7f   :  { %v47_v3 = vsel %vm46_vm0, %v41_v0, %v44_v2 }
  0x80   :  { %v48_v4 = vadd.f32 %v47_v3, %v40_v1 }
  0x82   :  { %50 = vst.msk [vmem:[#allocation7] sm:$0xff] %vm49_vm1, %v48_v4 }
  0x83   :  { %61 = dma.vmem_to_hbm [thread:$0]  %s57_s20, 128, %s59_s1, [#allocation4]  }
  0x84   :  { %149 = dma.done.wait [#allocation4], 128  }
  0x85   :  { %150 = vsyncadd [#allocation4], 4294967168 }
  0x86   :  { %66 = vsyncpa [#allocation3], 1 }
  0x87   :  { %67 = vsyncpa [#allocation6], 1 }
  0x88   :  { %68 = vsyncpa [#allocation4], 1 }

</bundles_post_ra>
